<compile_context>
chip_gen: v5e
topology: v5e:2x2
jax: 0.10.0
libtpu: 0.0.40
codegen_flags: <defaults>
</compile_context>

<pallas_src>
import functools

import jax
import jax.numpy as jnp
from jax.experimental import pallas as pl
from jax.experimental.pallas import tpu as pltpu


def _largest_divisor_leq(n, cap):
    best, d = 1, 1
    while d * d <= n:
        if n % d == 0:
            if d <= cap:
                best = max(best, d)
            e = n // d
            if e <= cap:
                best = max(best, e)
        d += 1
    return best


def _pick_tiles(N, C, S, elem_bytes, target_bytes=2 << 20):
    """Pick (Bn, St): batch elems and 128-lane groups per tile.

    Bn divides N; St divides S and is a multiple of 8 (or == S) so the
    (St, 128) trailing block dims satisfy the TPU (8, 128) tiling constraint.
    Per-input tile stays around `target_bytes` (~2 MiB), which double-buffers
    comfortably inside every chip generation's default scoped VMEM.
    """
    per_sgroup = C * 128 * elem_bytes          # one (C, 1, 128) slab
    per_batch = S * per_sgroup                 # one full batch element
    if per_batch <= target_bytes:
        cap = max(1, target_bytes // per_batch)
        return _largest_divisor_leq(N, cap), S
    cap = max(8, target_bytes // per_sgroup)
    if S <= cap:
        return 1, S
    st, m = 0, 8
    while m <= cap:                            # multiples of 8 dividing S
        if S % m == 0:
            st = m
        m += 8
    return 1, (st if st else S)


def masked_robust_kernel(y_ref, yh_ref, m_ref, out_ref, *, eps, q):
    # y_ref / yh_ref : (Bn, C, St, 128) VMEM tiles
    # m_ref          : (Bn, St, 128)    f32 {0,1} validity mask
    # out_ref        : (1, 1, 8, 128)   per-tile lane/sublane-parallel partials
    y = y_ref[...]
    yh = yh_ref[...]
    if y.dtype != jnp.float32:                 # only upcast sub-f32 inputs
        y = y.astype(jnp.float32)
        yh = yh.astype(jnp.float32)

    # Channel L1 distance: axis=1 is a leading axis -> pure VPU adds.
    sad = jnp.sum(jnp.abs(y - yh), axis=1)                  # (Bn, St, 128)
    # (sad + eps) ** q with a strictly positive base -> exp/log on the EUP.
    err = jnp.exp(q * jnp.log(sad + eps))                   # (Bn, St, 128)
    masked = err * m_ref[...]                               # (Bn, St, 128)

    # Fold into an (8, 128) partial-sum slab using only leading-axis (VPU) adds.
    part = jnp.sum(masked, axis=0)                          # (St, 128)
    st = part.shape[0]
    pad_rows = (-st) % 8
    if pad_rows:
        part = jnp.concatenate(
            [part, jnp.zeros((pad_rows, 128), jnp.float32)], axis=0)
    out_ref[0, 0] = part.reshape(-1, 8, 128).sum(axis=0)    # (8, 128)


def masked_robust_loss(y, y_hat, mask, *, eps, q):
    """Pallas implementation of MaskedRobustLoss.forward(y, y_hat, mask).

    y, y_hat: (N, C, H, W); mask: boolean with one value per (n, h, w)
    (e.g. (N, 1, H, W) as in the PyTorch module).
    """
    assert y.shape == y_hat.shape
    N, C, H, W = y.shape
    HW = H * W
    assert mask.size == N * HW, "mask must have one entry per (n, h, w)"

    y2 = y.reshape(N, C, HW)
    yh2 = y_hat.reshape(N, C, HW)
    m2 = mask.reshape(N, HW).astype(jnp.float32)

    # Pad HW to a multiple of 128 (lane width); padded pixels are masked out.
    HW_pad = ((HW + 127) // 128) * 128
    if HW_pad != HW:
        pad = HW_pad - HW
        y2 = jnp.pad(y2, ((0, 0), (0, 0), (0, pad)))
        yh2 = jnp.pad(yh2, ((0, 0), (0, 0), (0, pad)))
        m2 = jnp.pad(m2, ((0, 0), (0, pad)))
    S = HW_pad // 128

    y4 = y2.reshape(N, C, S, 128)
    yh4 = yh2.reshape(N, C, S, 128)
    m3 = m2.reshape(N, S, 128)

    Bn, St = _pick_tiles(N, C, S, y.dtype.itemsize)
    nb, nh = N // Bn, S // St

    kernel = functools.partial(masked_robust_kernel, eps=float(eps), q=float(q))

    # NOTE: if DMA were still exposed for very large inputs, the next lever is
    # pipeline_mode=pl.Buffered(3) on the two big in_specs and/or raising
    # vmem_limit_bytes (v6e) -- not needed at these tile sizes.
    partials = pl.pallas_call(
        kernel,
        out_shape=jax.ShapeDtypeStruct((nb, nh, 8, 128), jnp.float32),
        grid_spec=pltpu.PrefetchScalarGridSpec(
            num_scalar_prefetch=0,
            grid=(nb, nh),
            in_specs=[
                pl.BlockSpec((Bn, C, St, 128), lambda b, h: (b, 0, h, 0)),
                pl.BlockSpec((Bn, C, St, 128), lambda b, h: (b, 0, h, 0)),
                pl.BlockSpec((Bn, St, 128), lambda b, h: (b, h, 0)),
            ],
            out_specs=pl.BlockSpec((1, 1, 8, 128), lambda b, h: (b, h, 0, 0)),
        ),
        compiler_params=pltpu.CompilerParams(
            # Each step owns its output block -> fully parallel grid
            # (lets v7x shard across both TensorCores).
            dimension_semantics=("parallel", "parallel")),
    )(y4, yh4, m3)

    # Tiny final collapse (nb*nh*1024 floats) done in plain JAX.
    return jnp.sum(partials)


if __name__ == "__main__":
    key = jax.random.PRNGKey(0)
    k1, k2, k3 = jax.random.split(key, 3)

    # Flow-like tensors: batch=2, channels=4, spatial=16x16 (NCHW), per-pixel mask.
    N, C, H, W = 2, 4, 16, 16
    eps, q = 0.01, 0.4
    y = jax.random.normal(k1, (N, C, H, W), dtype=jnp.float32)
    y_hat = jax.random.normal(k2, (N, C, H, W), dtype=jnp.float32)
    mask = jax.random.bernoulli(k3, 0.7, (N, 1, H, W))

    loss = jax.block_until_ready(masked_robust_loss(y, y_hat, mask, eps=eps, q=q))

    # Reference (plain JAX) matching the PyTorch module exactly.
    err = (jnp.sum(jnp.abs(y - y_hat), axis=1, keepdims=True) + eps) ** q
    ref = jnp.sum(jnp.where(mask, err, 0.0))
    assert jnp.allclose(loss, ref, rtol=1e-4, atol=1e-5), (loss, ref)

    print("KERNEL_OK")
</pallas_src>

<mosaic_0001>
module attributes {stable_mosaic.version = 11 : i64} {
  func.func @masked_robust_kernel(%arg0: i32, %arg1: i32, %arg2: memref<2x4x2x128xf32, #tpu.memory_space<vmem>>, %arg3: memref<2x4x2x128xf32, #tpu.memory_space<vmem>>, %arg4: memref<2x2x128xf32, #tpu.memory_space<vmem>>, %arg5: memref<1x1x8x128xf32, #tpu.memory_space<vmem>>) attributes {dimension_semantics = [#tpu.dimension_semantics<parallel>, #tpu.dimension_semantics<parallel>], iteration_bounds = array<i64: 1, 1>, scalar_prefetch = 0 : i64, scratch_operands = 0 : i64, tpu.core_type = #tpu.core_type<tc>, window_params = [{transform_indices = @transform_0, window_bounds = array<i64: 2, 4, 2, 128>}, {transform_indices = @transform_1, window_bounds = array<i64: 2, 4, 2, 128>}, {transform_indices = @transform_2, window_bounds = array<i64: 2, 2, 128>}, {transform_indices = @transform_3, window_bounds = array<i64: 1, 1, 8, 128>}]} {
    %c0 = arith.constant 0 : index
    %c0_0 = arith.constant 0 : index
    %c0_1 = arith.constant 0 : index
    %c0_2 = arith.constant 0 : index
    %0 = vector.load %arg2[%c0, %c0_0, %c0_1, %c0_2] : memref<2x4x2x128xf32, #tpu.memory_space<vmem>>, vector<2x4x2x128xf32>
    %c0_3 = arith.constant 0 : index
    %c0_4 = arith.constant 0 : index
    %c0_5 = arith.constant 0 : index
    %c0_6 = arith.constant 0 : index
    %1 = vector.load %arg3[%c0_3, %c0_4, %c0_5, %c0_6] : memref<2x4x2x128xf32, #tpu.memory_space<vmem>>, vector<2x4x2x128xf32>
    %2 = arith.subf %0, %1 : vector<2x4x2x128xf32>
    %3 = math.absf %2 : vector<2x4x2x128xf32>
    %cst = arith.constant dense<0.000000e+00> : vector<2x2x128xf32>
    %4 = vector.multi_reduction <add>, %3, %cst [1] : vector<2x4x2x128xf32> to vector<2x2x128xf32>
    %cst_7 = arith.constant 0.00999999977 : f32
    %5 = vector.broadcast %cst_7 : f32 to vector<2x2x128xf32>
    %6 = arith.addf %4, %5 : vector<2x2x128xf32>
    %7 = math.log %6 : vector<2x2x128xf32>
    %cst_8 = arith.constant 4.000000e-01 : f32
    %8 = vector.broadcast %cst_8 : f32 to vector<2x2x128xf32>
    %9 = arith.mulf %8, %7 : vector<2x2x128xf32>
    %10 = math.exp %9 : vector<2x2x128xf32>
    %c0_9 = arith.constant 0 : index
    %c0_10 = arith.constant 0 : index
    %c0_11 = arith.constant 0 : index
    %11 = vector.load %arg4[%c0_9, %c0_10, %c0_11] : memref<2x2x128xf32, #tpu.memory_space<vmem>>, vector<2x2x128xf32>
    %12 = arith.mulf %10, %11 : vector<2x2x128xf32>
    %cst_12 = arith.constant dense<0.000000e+00> : vector<2x128xf32>
    %13 = vector.multi_reduction <add>, %12, %cst_12 [0] : vector<2x2x128xf32> to vector<2x128xf32>
    %cst_13 = arith.constant 0.000000e+00 : f32
    %14 = vector.broadcast %cst_13 : f32 to vector<6x128xf32>
    %15 = tpu.concatenate %13, %14 in 0 : vector<2x128xf32>, vector<6x128xf32> -> vector<8x128xf32>
    %16 = vector.shape_cast %15 : vector<8x128xf32> to vector<1x8x128xf32>
    %cst_14 = arith.constant dense<0.000000e+00> : vector<8x128xf32>
    %17 = vector.multi_reduction <add>, %16, %cst_14 [0] : vector<1x8x128xf32> to vector<8x128xf32>
    %c0_15 = arith.constant 0 : index
    %c0_16 = arith.constant 0 : index
    %c0_17 = arith.constant 0 : index
    %c0_18 = arith.constant 0 : index
    %18 = vector.load %arg5[%c0_15, %c0_16, %c0_17, %c0_18] : memref<1x1x8x128xf32, #tpu.memory_space<vmem>>, vector<1x1x8x128xf32>
    %19 = vector.shape_cast %18 : vector<1x1x8x128xf32> to vector<8x128xf32>
    %20 = vector.shape_cast %17 : vector<8x128xf32> to vector<1x1x8x128xf32>
    tpu.vector_store %arg5[%c0_15, %c0_16, %c0_17, %c0_18], %20 {strides = array<i32>} : memref<1x1x8x128xf32, #tpu.memory_space<vmem>>, vector<1x1x8x128xf32>,
    return
  }
  func.func @transform_0(%arg0: i32, %arg1: i32) -> (i32, i32, i32, i32) {
    %c0_i32 = arith.constant 0 : i32
    %c0_i32_0 = arith.constant 0 : i32
    %c0_i32_1 = arith.constant 0 : i32
    return %arg0, %c0_i32, %arg1, %c0_i32_0 : i32, i32, i32, i32
  }
  func.func @transform_1(%arg0: i32, %arg1: i32) -> (i32, i32, i32, i32) {
    %c0_i32 = arith.constant 0 : i32
    %c0_i32_0 = arith.constant 0 : i32
    %c0_i32_1 = arith.constant 0 : i32
    return %arg0, %c0_i32, %arg1, %c0_i32_0 : i32, i32, i32, i32
  }
  func.func @transform_2(%arg0: i32, %arg1: i32) -> (i32, i32, i32) {
    %c0_i32 = arith.constant 0 : i32
    %c0_i32_0 = arith.constant 0 : i32
    return %arg0, %arg1, %c0_i32 : i32, i32, i32
  }
  func.func @transform_3(%arg0: i32, %arg1: i32) -> (i32, i32, i32, i32) {
    %c0_i32 = arith.constant 0 : i32
    %c0_i32_0 = arith.constant 0 : i32
    %c0_i32_1 = arith.constant 0 : i32
    return %arg0, %arg1, %c0_i32, %c0_i32_0 : i32, i32, i32, i32
  }
}

</mosaic_0001>

<bundles_post_ra>
// kernel: tpu_custom_call.1
= control target key start
LH: loop header
LB: loop body
LE: loop exit
PB: predicated region body
PF: predicated region fallthrough
CT: control target
= control target key end

     0   :  { %8 = vsyncpa [#allocation3], 0  ;;  %s314_s0 = inlined_call_operand.hbm [shape: f32[2,4,2,128], index: 0, kind: input, shape index: {}]   ;;  %s315_s1 = inlined_call_operand.hbm [shape: f32[2,4,2,128], index: 1, kind: input, shape index: {}]   ;;  %s316_s2 = inlined_call_operand.hbm [shape: f32[2,2,128], index: 2, kind: input, shape index: {}]   ;;  %s317_s3 = inlined_call_operand.hbm [shape: f32[1,1,8,128], index: 3, kind: output, shape index: {}]  }
   0x1   :  { %9 = vsyncpa [#allocation6], 0 }
   0x2   :  { %10 = vsyncpa [#allocation4], 0  ;;  %s28_s14 = sshll.u32 %s315_s1, 4  ;;  %s265_s15 = smov [#allocation5]   ;;  %s29_s14 = int_to_ptr.hbm [resolvable:$true] %s28_s14 }
   0x3   :  { %s30_s16 = sshll.u32 %s265_s15, 4  ;;  %s15_s19 = sshll.u32 %s314_s0, 4  ;;  %s31_s16 = int_to_ptr.vmem [resolvable:$true] %s30_s16  ;;  %s16_s19 = int_to_ptr.hbm [resolvable:$true] %s15_s19 }
   0x4   :  { %s266_s20 = smov 32   ;;  %s267_s21 = smov 2  }
   0x5   :  { %36 = dma.hbm_to_vmem [thread:$0]  %s29_s14, 256, %s31_s16, [#allocation6], %s266_s20, %s266_s20, %s267_s21  }
   0x6   :  { %s268_s22 = smov [#allocation2]   ;;  %s41_s26 = sshll.u32 %s316_s2, 4  ;;  %s42_s26 = int_to_ptr.hbm [resolvable:$true] %s41_s26 }
   0x7   :  { %s17_s23 = sshll.u32 %s268_s22, 4  ;;  %s269_s1 = smov [#allocation7]   ;;  %s18_s23 = int_to_ptr.vmem [resolvable:$true] %s17_s23 }
   0x8   :  { %23 = dma.hbm_to_vmem [thread:$0]  %s16_s19, 256, %s18_s23, [#allocation3], %s266_s20, %s266_s20, %s267_s21  }
   0x9   :  { %s43_s27 = sshll.u32 %s269_s1, 4  ;;  %s44_s27 = int_to_ptr.vmem [resolvable:$true] %s43_s27 }
   0xa   :  { %49 = dma.hbm_to_vmem [thread:$0]  %s42_s26, 64, %s44_s27, [#allocation6], %s266_s20, %s266_s20, %s267_s21  }
   0xb   :  { %259 = dma.done.wait [#allocation3], 256  }
   0xc   :  { %260 = vsyncadd [#allocation3], 4294967040 }
   0xd   :  { %261 = dma.done.wait [#allocation6], 320  }
   0xe   :  { %262 = vsyncadd [#allocation6], 4294966976  ;;  %vm94_vm0 = vcmask 1041408   ;;  %v62_v0 = vld [vmem:[#allocation2] sm:$0x3]  ;;  %s270_s0 = smov [#allocation8]  }
   0xf   :  { %v63_v1 = vld [vmem:[#allocation2 + $0x2] sm:$0x3]  ;;  %v64_v2 = vld [vmem:[#allocation2 + $0x4] sm:$0x3]  ;;  %v65_v3 = vld [vmem:[#allocation2 + $0x6] sm:$0x3] }
  0x10   :  { %v66_v4 = vld [vmem:[#allocation2 + $0x8] sm:$0x3]  ;;  %v67_v5 = vld [vmem:[#allocation2 + $0xa] sm:$0x3]  ;;  %v68_v6 = vld [vmem:[#allocation2 + $0xc] sm:$0x3] }
  0x11   :  { %v69_v7 = vld [vmem:[#allocation2 + $0xe] sm:$0x3]  ;;  %v70_v8 = vld [vmem:[#allocation5] sm:$0x3]  ;;  %v71_v9 = vld [vmem:[#allocation5 + $0x2] sm:$0x3] }
  0x12   :  { %v72_v10 = vld [vmem:[#allocation5 + $0x4] sm:$0x3]  ;;  %v73_v11 = vld [vmem:[#allocation5 + $0x6] sm:$0x3]  ;;  %v78_v12 = vsub.f32 %v62_v0, %v70_v8  ;;  %v74_v13 = vld [vmem:[#allocation5 + $0x8] sm:$0x3]  ;;  %v79_v16 = vsub.f32 %v63_v1, %v71_v9 }
  0x13   :  { %v75_v14 = vld [vmem:[#allocation5 + $0xa] sm:$0x3]  ;;  %v76_v15 = vld [vmem:[#allocation5 + $0xc] sm:$0x3]  ;;  %v80_v17 = vsub.f32 %v64_v2, %v72_v10  ;;  %v81_v18 = vsub.f32 %v65_v3, %v73_v11  ;;  %v77_v19 = vld [vmem:[#allocation5 + $0xe] sm:$0x3]  ;;  %v82_v20 = vsub.f32 %v66_v4, %v74_v13 }
  0x14   :  { %v83_v21 = vsub.f32 %v67_v5, %v75_v14  ;;  %v84_v22 = vsub.f32 %v68_v6, %v76_v15  ;;  %v86_v23 = vand.u32 2147483647, %v78_v12  ;;  %v85_v24 = vsub.f32 %v69_v7, %v77_v19  ;;  %v121_v56 = vld [vmem:[#allocation7] sm:$0x3]  ;;  %v122_v57 = vld [vmem:[#allocation7 + $0x2] sm:$0x3] }
  0x15   :  { %v87_v25 = vand.u32 2147483647, %v79_v16  ;;  %v88_v26 = vand.u32 2147483647, %v80_v17  ;;  %v89_v27 = vand.u32 2147483647, %v81_v18 }
  0x16   :  { %v90_v28 = vand.u32 2147483647, %v82_v20  ;;  %v91_v29 = vand.u32 2147483647, %v83_v21  ;;  %v92_v30 = vand.u32 2147483647, %v84_v22 }
  0x17   :  { %v93_v31 = vand.u32 2147483647, %v85_v24  ;;  %v95_v32 = vsel %vm94_vm0, %v86_v23, 0.0  ;;  %v96_v33 = vsel %vm94_vm0, %v87_v25, 0.0  ;;  %v98_v34 = vsel %vm94_vm0, %v88_v26, 0.0  ;;  %s136_s2 = sshll.u32 %s270_s0, 4  ;;  %s137_s2 = int_to_ptr.vmem [resolvable:$true] %s136_s2 }
  0x18   :  { %v97_v35 = vadd.f32 %v96_v33, %v95_v32  ;;  %v102_v36 = vsel %vm94_vm0, %v90_v28, 0.0  ;;  %v103_v37 = vsel %vm94_vm0, %v91_v29, 0.0  ;;  %v100_v38 = vsel %vm94_vm0, %v89_v27, 0.0  ;;  %s138_s30 = sshll.u32 %s317_s3, 4  ;;  %s139_s30 = int_to_ptr.hbm [resolvable:$true] %s138_s30 }
  0x19   :  { %v104_v39 = vadd.f32 %v103_v37, %v102_v36  ;;  %v105_v40 = vsel %vm94_vm0, %v92_v30, 0.0  ;;  %v107_v42 = vsel %vm94_vm0, %v93_v31, 0.0 }
  0x1a   :  { %v99_v41 = vadd.f32 %v98_v34, %v97_v35 }
  0x1b   :  { %v106_v43 = vadd.f32 %v105_v40, %v104_v39 }
  0x1c   :  { %v101_v44 = vadd.f32 %v100_v38, %v99_v41 }
  0x1d   :  { %v108_v45 = vadd.f32 %v107_v42, %v106_v43 }
  0x1e   :  { %v109_v46 = vadd.f32 0.01, %v101_v44 }
  0x1f   :  { %v110_v47 = vadd.f32 0.01, %v108_v45 }
  0x20   :  { %155 = vlog2.f32 %v109_v46 }
  0x21   :  { %157 = vlog2.f32 %v110_v47 }
  0x26   :  { %v156_v48 = vpop.eup %155 }
  0x27   :  { %v158_v49 = vpop.eup %157  ;;  %v112_v50 = vmul.f32 0.6931472, %v156_v48 }
  0x28   :  { %v114_v51 = vmul.f32 0.6931472, %v158_v49 }
  0x29   :  { %v115_v52 = vmul.f32 0.4, %v112_v50 }
  0x2a   :  { %v116_v53 = vmul.f32 0.4, %v114_v51 }
  0x2b   :  { %v117_v54 = vmul.f32 1.442695, %v115_v52 }
  0x2c   :  { %v119_v55 = vmul.f32 1.442695, %v116_v53 }
  0x2d   :  { %159 = vpow2.f32 %v117_v54 }
  0x2e   :  { %161 = vpow2.f32 %v119_v55 }
  0x33   :  { %v160_v58 = vpop.eup %159 }
  0x34   :  { %v162_v59 = vpop.eup %161  ;;  %v123_v60 = vmul.f32 %v160_v58, %v121_v56 }
  0x35   :  { %v124_v61 = vmul.f32 %v162_v59, %v122_v57 }
  0x36   :  { %v125_v62 = vsel %vm94_vm0, %v123_v60, 0.0 }
  0x37   :  { %v126_v63 = vsel %vm94_vm0, %v124_v61, 0.0 }
  0x38   :  { %v127_v0 = vadd.f32 %v126_v63, %v125_v62 }
  0x3a   :  { %v128_v1 = vsel %vm94_vm0, %v127_v0, 0.0 }
  0x3b   :  { %130 = vst [vmem:[#allocation8] sm:$0xff] %v128_v1 }
  0x3c   :  { %141 = dma.vmem_to_hbm [thread:$0]  %s137_s2, 128, %s139_s30, [#allocation4]  }
  0x3d   :  { %263 = dma.done.wait [#allocation4], 128  }
  0x3e   :  { %264 = vsyncadd [#allocation4], 4294967168 }
  0x3f   :  { %146 = vsyncpa [#allocation3], 1 }
  0x40   :  { %147 = vsyncpa [#allocation6], 1 }
  0x41   :  { %148 = vsyncpa [#allocation4], 1 }

</bundles_post_ra>
